<compile_context>
chip_gen: v7x
topology: tpu7x:2x2x1
jax: 0.10.0
libtpu: 0.0.40
codegen_flags: <defaults>
</compile_context>

<pallas_src>
import jax
import jax.numpy as jnp
from jax import lax
from jax.experimental import pallas as pl
from jax.experimental.pallas import tpu as pltpu

EPS = 1e-5  # PyTorch BatchNorm1d default


def _bn_kernel(x_ref, g_ref, b_ref, o_ref):
    # x_ref: (bs, tc, T) input dtype ; g_ref/b_ref: (tc, 1) f32 ; o_ref: (bs, tc, T) input dtype
    x = x_ref[...]
    xf = x.astype(jnp.float32)

    # One-pass stats: reduce batch (axis 0) first with VPU adds, then a single
    # cross-lane (XLU) reduce over T per channel.
    s1 = jnp.sum(xf, axis=0)                                  # (tc, T)
    s2 = jnp.sum(xf * xf, axis=0)                             # (tc, T)
    inv_n = 1.0 / float(x.shape[0] * x.shape[2])              # static block dims
    mean = jnp.sum(s1, axis=-1, keepdims=True) * inv_n        # (tc, 1)
    ex2 = jnp.sum(s2, axis=-1, keepdims=True) * inv_n         # (tc, 1)
    var = jnp.maximum(ex2 - mean * mean, 0.0)                 # biased variance, clamped
    inv = lax.rsqrt(var + EPS)                                # EUP rsqrt

    scale = inv * g_ref[...]                                  # (tc, 1)
    bias = b_ref[...] - mean * scale                          # (tc, 1)
    y = xf * scale[None, :, :] + bias[None, :, :]             # fused: 1 mul + 1 add / elem
    o_ref[...] = y.astype(o_ref.dtype)


def _vmem_limit_bytes():
    """Generation-aware scoped-VMEM limit (leave Mosaic headroom on 64-MiB chips)."""
    cap = None
    try:
        cap = getattr(pltpu.get_tpu_info(), "vmem_capacity_bytes", None)
    except Exception:
        cap = None
    if cap is None:
        cap = 64 << 20                      # conservative if query unavailable
    if cap <= (64 << 20):
        return 48 << 20                     # v7x-class: 64 MiB total per TC
    return 96 << 20                         # v5e/v6e: 128 MiB physical


def _choose_tile_c(C, bs, T, itemsize, vmem_limit_bytes):
    """Channel tile size: big enough to fill ~55% of scoped VMEM with the
    2-in + 2-out double buffers, but always >= 2 blocks (megacore) when C allows.
    Tail blocks (C % tc != 0) are accepted; no divisibility shrinking."""
    align = {4: 8, 2: 16, 1: 32}.get(itemsize, 8)   # sublane alignment for the input dtype
    budget = int(vmem_limit_bytes * 0.55)
    per_c = 4 * bs * T * itemsize                    # 2 in + 2 out buffers, per channel row
    max_tc = max(align, budget // max(per_c, 1))

    if C >= 2 * align:
        # Cap at ~C/2 (aligned) so the grid has >= 2 blocks for the v7x megacore split.
        cap = ((-(-C // 2)) + align - 1) // align * align
    else:
        cap = C

    tc = min(max_tc, cap, C)
    if tc < C:
        tc = max(align, (tc // align) * align)       # sublane-align partial-C tiles
    return tc


def norm_data_forward(x, gamma, beta):
    """x: (bs, c, V, T) float; gamma, beta: (c*V,) float. Returns same shape/dtype as x."""
    bs, c, V, T = x.shape
    C = c * V
    assert gamma.shape == (C,) and beta.shape == (C,)

    xr = x.reshape(bs, C, T)                          # free view (c, V contiguous)
    g = gamma.astype(jnp.float32).reshape(C, 1)
    b = beta.astype(jnp.float32).reshape(C, 1)

    itemsize = jnp.dtype(x.dtype).itemsize
    vmem_limit = _vmem_limit_bytes()
    tc = _choose_tile_c(C, bs, T, itemsize, vmem_limit)
    grid = (pl.cdiv(C, tc),)

    out = pl.pallas_call(
        _bn_kernel,
        out_shape=jax.ShapeDtypeStruct((bs, C, T), x.dtype),
        grid=grid,
        in_specs=[
            pl.BlockSpec((bs, tc, T), lambda i: (0, i, 0)),
            pl.BlockSpec((tc, 1), lambda i: (i, 0)),
            pl.BlockSpec((tc, 1), lambda i: (i, 0)),
        ],
        out_specs=pl.BlockSpec((bs, tc, T), lambda i: (0, i, 0)),
        compiler_params=pltpu.CompilerParams(
            dimension_semantics=("parallel",),        # megacore split over channel tiles
            vmem_limit_bytes=vmem_limit,
        ),
        cost_estimate=pl.CostEstimate(
            flops=6 * bs * C * T,
            transcendentals=C,
            bytes_accessed=2 * bs * C * T * itemsize + 2 * C * 4,
        ),
    )(xr, g, b)

    return out.reshape(bs, c, V, T)


def _reference(x, gamma, beta):
    bs, c, V, T = x.shape
    C = c * V
    xr = x.reshape(bs, C, T).astype(jnp.float32)
    mean = jnp.mean(xr, axis=(0, 2), keepdims=True)
    var = jnp.mean((xr - mean) ** 2, axis=(0, 2), keepdims=True)
    y = (xr - mean) / jnp.sqrt(var + EPS)
    y = y * gamma.reshape(1, C, 1) + beta.reshape(1, C, 1)
    return y.reshape(bs, c, V, T).astype(x.dtype)


if __name__ == "__main__":
    key = jax.random.PRNGKey(0)

    # Case 1: dim = c*V = 64 (matches norm_data(dim=64)); channel grid splits evenly.
    # Case 2: C = 25 (non-dividing channel count) to exercise the padded tail block.
    cases = [(2, 4, 16, 16), (2, 5, 5, 16)]

    for bs, c, V, T in cases:
        C = c * V
        key, k_x, k_g, k_b = jax.random.split(key, 4)
        x = jax.random.normal(k_x, (bs, c, V, T), dtype=jnp.float32)
        # Deterministic synthetic BN affine params (PyTorch default would be ones/zeros).
        gamma = 1.0 + 0.1 * jax.random.normal(k_g, (C,), dtype=jnp.float32)
        beta = 0.1 * jax.random.normal(k_b, (C,), dtype=jnp.float32)

        out = norm_data_forward(x, gamma, beta)
        out = jax.block_until_ready(out)

        ref = _reference(x, gamma, beta)
        assert out.shape == (bs, c, V, T)
        err = float(jnp.max(jnp.abs(out.astype(jnp.float32) - ref.astype(jnp.float32))))
        assert err < 1e-4, err

    # TODO(synk): BatchNorm running_mean/running_var buffer updates are a training-time
    # side effect and do not affect the forward output; not modeled here.
    print("KERNEL_OK")
</pallas_src>

<mosaic_0001>
module attributes {stable_mosaic.version = 11 : i64} {
  func.func @_bn_kernel(%arg0: i32, %arg1: memref<2x32x16xf32, #tpu.memory_space<vmem>>, %arg2: memref<32x1xf32, #tpu.memory_space<vmem>>, %arg3: memref<32x1xf32, #tpu.memory_space<vmem>>, %arg4: memref<2x32x16xf32, #tpu.memory_space<vmem>>) attributes {dimension_semantics = [#tpu.dimension_semantics<parallel>], iteration_bounds = array<i64: 2>, scalar_prefetch = 0 : i64, scratch_operands = 0 : i64, tpu.core_type = #tpu.core_type<tc>, window_params = [{transform_indices = @transform_0, window_bounds = array<i64: 2, 32, 16>}, {transform_indices = @transform_1, window_bounds = array<i64: 32, 1>}, {transform_indices = @transform_2, window_bounds = array<i64: 32, 1>}, {transform_indices = @transform_3, window_bounds = array<i64: 2, 32, 16>}]} {
    %c0 = arith.constant 0 : index
    %c0_0 = arith.constant 0 : index
    %c0_1 = arith.constant 0 : index
    %0 = vector.load %arg1[%c0, %c0_0, %c0_1] : memref<2x32x16xf32, #tpu.memory_space<vmem>>, vector<2x32x16xf32>
    %cst = arith.constant dense<0.000000e+00> : vector<32x16xf32>
    %1 = vector.multi_reduction <add>, %0, %cst [0] : vector<2x32x16xf32> to vector<32x16xf32>
    %2 = arith.mulf %0, %0 : vector<2x32x16xf32>
    %cst_2 = arith.constant dense<0.000000e+00> : vector<32x16xf32>
    %3 = vector.multi_reduction <add>, %2, %cst_2 [0] : vector<2x32x16xf32> to vector<32x16xf32>
    %cst_3 = arith.constant dense<0.000000e+00> : vector<32xf32>
    %4 = vector.multi_reduction <add>, %1, %cst_3 [1] : vector<32x16xf32> to vector<32xf32>
    %5 = vector.shape_cast %4 : vector<32xf32> to vector<32x1xf32>
    %cst_4 = arith.constant 3.125000e-02 : f32
    %6 = vector.broadcast %cst_4 : f32 to vector<32x1xf32>
    %7 = arith.mulf %5, %6 : vector<32x1xf32>
    %cst_5 = arith.constant dense<0.000000e+00> : vector<32xf32>
    %8 = vector.multi_reduction <add>, %3, %cst_5 [1] : vector<32x16xf32> to vector<32xf32>
    %9 = vector.shape_cast %8 : vector<32xf32> to vector<32x1xf32>
    %cst_6 = arith.constant 3.125000e-02 : f32
    %10 = vector.broadcast %cst_6 : f32 to vector<32x1xf32>
    %11 = arith.mulf %9, %10 : vector<32x1xf32>
    %12 = arith.mulf %7, %7 : vector<32x1xf32>
    %13 = arith.subf %11, %12 : vector<32x1xf32>
    %cst_7 = arith.constant 0.000000e+00 : f32
    %14 = vector.broadcast %cst_7 : f32 to vector<32x1xf32>
    %15 = arith.maximumf %13, %14 : vector<32x1xf32>
    %cst_8 = arith.constant 9.99999974E-6 : f32
    %16 = vector.broadcast %cst_8 : f32 to vector<32x1xf32>
    %17 = arith.addf %15, %16 : vector<32x1xf32>
    %18 = math.rsqrt %17 : vector<32x1xf32>
    %c0_9 = arith.constant 0 : index
    %c0_10 = arith.constant 0 : index
    %19 = vector.load %arg2[%c0_9, %c0_10] : memref<32x1xf32, #tpu.memory_space<vmem>>, vector<32x1xf32>
    %20 = arith.mulf %18, %19 : vector<32x1xf32>
    %c0_11 = arith.constant 0 : index
    %c0_12 = arith.constant 0 : index
    %21 = vector.load %arg3[%c0_11, %c0_12] : memref<32x1xf32, #tpu.memory_space<vmem>>, vector<32x1xf32>
    %22 = arith.mulf %7, %20 : vector<32x1xf32>
    %23 = arith.subf %21, %22 : vector<32x1xf32>
    %24 = vector.shape_cast %20 : vector<32x1xf32> to vector<1x32x1xf32>
    %25 = vector.broadcast %24 : vector<1x32x1xf32> to vector<2x32x16xf32>
    %26 = arith.mulf %0, %25 : vector<2x32x16xf32>
    %27 = vector.shape_cast %23 : vector<32x1xf32> to vector<1x32x1xf32>
    %28 = vector.broadcast %27 : vector<1x32x1xf32> to vector<2x32x16xf32>
    %29 = arith.addf %26, %28 : vector<2x32x16xf32>
    %c0_13 = arith.constant 0 : index
    %c0_14 = arith.constant 0 : index
    %c0_15 = arith.constant 0 : index
    %30 = vector.load %arg4[%c0_13, %c0_14, %c0_15] : memref<2x32x16xf32, #tpu.memory_space<vmem>>, vector<2x32x16xf32>
    tpu.vector_store %arg4[%c0_13, %c0_14, %c0_15], %29 {strides = array<i32>} : memref<2x32x16xf32, #tpu.memory_space<vmem>>, vector<2x32x16xf32>,
    return
  }
  func.func @transform_0(%arg0: i32) -> (i32, i32, i32) {
    %c0_i32 = arith.constant 0 : i32
    %c0_i32_0 = arith.constant 0 : i32
    %c0_i32_1 = arith.constant 0 : i32
    return %c0_i32, %arg0, %c0_i32_0 : i32, i32, i32
  }
  func.func @transform_1(%arg0: i32) -> (i32, i32) {
    %c0_i32 = arith.constant 0 : i32
    %c0_i32_0 = arith.constant 0 : i32
    return %arg0, %c0_i32 : i32, i32
  }
  func.func @transform_2(%arg0: i32) -> (i32, i32) {
    %c0_i32 = arith.constant 0 : i32
    %c0_i32_0 = arith.constant 0 : i32
    return %arg0, %c0_i32 : i32, i32
  }
  func.func @transform_3(%arg0: i32) -> (i32, i32, i32) {
    %c0_i32 = arith.constant 0 : i32
    %c0_i32_0 = arith.constant 0 : i32
    %c0_i32_1 = arith.constant 0 : i32
    return %c0_i32, %arg0, %c0_i32_0 : i32, i32, i32
  }
}

</mosaic_0001>

<bundles_post_ra>
// kernel: tpu_custom_call.1
= control target key start
LH: loop header
LB: loop body
LE: loop exit
PB: predicated region body
PF: predicated region fallthrough
CT: control target
= control target key end

     0   :  { %s702_s12 = smov 0   ;;  %s704_s13 = smov 0   ;;  %s871_s0 = inlined_call_operand.vmem [shape: f32[2,64,16], index: 0, kind: input, shape index: {}]   ;;  %s872_s1 = inlined_call_operand.vmem [shape: f32[64,1], index: 1, kind: input, shape index: {}]   ;;  %s873_s2 = inlined_call_operand.vmem [shape: f32[64,1], index: 2, kind: input, shape index: {}]   ;;  %s874_s3 = inlined_call_operand.vmem [shape: f32[2,64,16], index: 3, kind: output, shape index: {}]  }
   0x1   :  { %s706_s14 = smov 0  }
   0x2 LB: > { %s718_s15 = sadd.s32 4294967295, %s679_s14   ;;  %s721_s16 = sadd.s32 1, %s679_s14   ;;  %s679_s14 = sphi %s706_s14, %s878_s14   ;;  %s675_s13 = sphi %s704_s13, %s877_s13   ;;  %s671_s12 = sphi %s702_s12, %s876_s12  }
   0x3   : > { %s17_s17 = ssub.s32 %s679_s14, %s721_s16  ;;  %s20_s18 = sadd.s32 1, %s675_s13 }
   0x4   : > { %p18_p0 = scmp.eq.s32.totalorder %s17_s17, 0  ;;  %p27_p1 = scmp.ne.s32.totalorder %s675_s13, %s671_s12 }
   0x5   : > { %p28_p2 = scmp.eq.s32.totalorder %s679_s14, 0  ;;  %p109_p3 = scmp.eq.s32.totalorder %s718_s15, 1 }
   0x6   : > { %s731_s19 = scalar_select %p18_p0, %s675_s13, %s20_s18  }
   0x7   : > { %p29_p4 = por %p28_p2, %p27_p1  ;;  %p733_p5 = por %p109_p3, %p27_p1 }
   0x8   : > { %p604_p6 = scmp.ge.s32.totalorder %s679_s14, 2 }
   0xa   : > { %131 = sbr.rel (%p604_p6) target bundleno = 25 (0x19), region = 16 }
  0x11   : > { %134 = sbr.rel (!%p29_p4) target bundleno = 25 (0x19), region = 20  ;;  %s136_s21 = sand.u32 (%p29_p4), 1, %s675_s13  }
  0x12   : > { %s620_s22 = sshll.u32 (%p29_p4), %s679_s14, 5  ;;  %s605_s23 = sshll.u32 (%p29_p4), %s136_s21, 6 }
  0x13   : > { %s141_s26 = scalar_lea.vmem (%p29_p4), %s871_s0, %s620_s22  ;;  %s138_s27 = scalar_lea.vmem (%p29_p4), [#allocation2], %s605_s23 }
  0x14   : > { %v183_v0 = vld [vmem:[%s141_s26] sm:$0xff] (%p29_p4)  ;;  %v185_v1 = vld [vmem:[%s141_s26 + $0x8] sm:$0xff] (%p29_p4)  ;;  %v187_v2 = vld [vmem:[%s141_s26 + $0x10] sm:$0xff] (%p29_p4) }
  0x15   : > { %184 = vst [vmem:[%s138_s27] sm:$0xff] (%p29_p4), %v183_v0  ;;  %186 = vst [vmem:[%s138_s27 + $0x8] sm:$0xff] (%p29_p4), %v185_v1  ;;  %v189_v3 = vld [vmem:[%s141_s26 + $0x18] sm:$0xff] (%p29_p4)  ;;  %v191_v4 = vld [vmem:[%s141_s26 + $0x40] sm:$0xff] (%p29_p4) }
  0x16   : > { %188 = vst [vmem:[%s138_s27 + $0x10] sm:$0xff] (%p29_p4), %v187_v2  ;;  %v193_v5 = vld [vmem:[%s141_s26 + $0x48] sm:$0xff] (%p29_p4)  ;;  %190 = vst [vmem:[%s138_s27 + $0x18] sm:$0xff] (%p29_p4), %v189_v3  ;;  %v195_v6 = vld [vmem:[%s141_s26 + $0x50] sm:$0xff] (%p29_p4) }
  0x17   : > { %192 = vst [vmem:[%s138_s27 + $0x20] sm:$0xff] (%p29_p4), %v191_v4  ;;  %194 = vst [vmem:[%s138_s27 + $0x28] sm:$0xff] (%p29_p4), %v193_v5  ;;  %v197_v7 = vld [vmem:[%s141_s26 + $0x58] sm:$0xff] (%p29_p4) }
  0x18   : > { %196 = vst [vmem:[%s138_s27 + $0x30] sm:$0xff] %v195_v6  ;;  %198 = vst [vmem:[%s138_s27 + $0x38] sm:$0xff] %v197_v7 }
  0x19 PF: > { %p608_p7 = scmp.ge.s32.totalorder %s679_s14, 1  ;;  %p221_p8 = scmp.lt.s32.totalorder %s679_s14, 3 }
  0x1b   : > { %p222_p9 = pnand %p608_p7, %p221_p8 }
  0x1c   : > { %s228_s28 = sand.u32 (!%p222_p9), 1, %s671_s12   ;;  %vm282_vm0 = vcmask (!%p222_p9), 130048   ;;  %v681_v56 = vmov (!%p222_p9), 0   ;;  %s611_s4 = sshll.u32 (!%p222_p9), %s718_s15, 2 }
  0x1d   : > { %225 = sbr.rel (%p222_p9) target bundleno = 372 (0x174), region = 66  ;;  %s746_s29 = sshll.u32 (!%p222_p9), %s228_s28, 6  ;;  %648 = vset.pattern.permute.xlu1 (!%p222_p9), %v681_v56  ;;  %647 = vset.pattern.permute.xlu0 (!%p222_p9), %v681_v56 }
  0x1e   : > { %s230_s30 = scalar_lea.vmem (!%p222_p9), [#allocation2], %s746_s29  ;;  %p262_p10 = scmp.lt.s32.totalorder (!%p222_p9), %s611_s4, 7 }
  0x1f   : > { %v749_v8 = vld [vmem:[%s230_s30 + $0x10] sm:$0xff] (!%p222_p9)  ;;  %v753_v10 = vld [vmem:[%s230_s30] sm:$0xff] (!%p222_p9)  ;;  %v763_v15 = vld [vmem:[%s230_s30 + $0x18] sm:$0xff] (!%p222_p9)  ;;  %s825_s12 = scalar_lea.vmem (!%p222_p9), [#allocation3], %s746_s29 }
  0x20   : > { %v751_v9 = vld [vmem:[%s230_s30 + $0x30] sm:$0xff] (!%p222_p9)  ;;  %v289_v11 = vsel (!%p222_p9), %vm282_vm0, %v749_v8, 0.0  ;;  %v759_v13 = vld [vmem:[%s230_s30 + $0x20] sm:$0xff] (!%p222_p9)  ;;  %v283_v14 = vsel (!%p222_p9), %vm282_vm0, %v753_v10, 0.0  ;;  %v765_v16 = vld [vmem:[%s230_s30 + $0x38] sm:$0xff] (!%p222_p9)  ;;  %v295_v17 = vmul.f32 (!%p222_p9), %v753_v10, %v753_v10  ;;  %v292_v20 = vsel (!%p222_p9), %vm282_vm0, %v763_v15, 0.0 }
  0x21   : > { %v290_v12 = vsel (!%p222_p9), %vm282_vm0, %v751_v9, 0.0  ;;  %v284_v19 = vsel (!%p222_p9), %vm282_vm0, %v759_v13, 0.0  ;;  %v293_v21 = vsel (!%p222_p9), %vm282_vm0, %v765_v16, 0.0  ;;  %v775_v22 = vld [vmem:[%s230_s30 + $0x8] sm:$0xff] (!%p222_p9)  ;;  %v299_v34 = vmul.f32 (!%p222_p9), %v759_v13, %v759_v13 }
  0x22   : > { %v291_v18 = vadd.f32 (!%p222_p9), %v290_v12, %v289_v11  ;;  %v777_v23 = vld [vmem:[%s230_s30 + $0x28] sm:$0xff] (!%p222_p9)  ;;  %v285_v24 = vadd.f32 (!%p222_p9), %v284_v19, %v283_v14  ;;  %v294_v25 = vadd.f32 (!%p222_p9), %v293_v21, %v292_v20  ;;  %v286_v26 = vsel (!%p222_p9), %vm282_vm0, %v775_v22, 0.0 }
  0x23   : > { %v287_v27 = vsel (!%p222_p9), %vm282_vm0, %v777_v23, 0.0  ;;  %v296_v30 = vmul.f32 (!%p222_p9), %v775_v22, %v775_v22  ;;  %v300_v31 = vmul.f32 (!%p222_p9), %v777_v23, %v777_v23  ;;  %v303_v35 = vsel (!%p222_p9), %vm282_vm0, %v295_v17, 0.0 }
  0x24   : > { %v321_v28 = vsel %vm282_vm0, %v291_v18, 0.0  ;;  %v288_v29 = vadd.f32 %v287_v27, %v286_v26  ;;  %v315_v32 = vsel %vm282_vm0, %v285_v24, 0.0  ;;  %v324_v33 = vsel %vm282_vm0, %v294_v25, 0.0  ;;  %s880_s4 = smov (!%p262_p10, %s611_s4), 7  ;;  %s621_s14 = sshll.u32 (%p733_p5), %s718_s15, 5 }
  0x25   : > { %322 = vadd.xlane.f32.xlu1 %v321_v28  ;;  %316 = vadd.xlane.f32.xlu0 %v315_v32  ;;  %v306_v37 = vsel %vm282_vm0, %v296_v30, 0.0  ;;  %v307_v38 = vsel %vm282_vm0, %v300_v31, 0.0  ;;  %v298_v39 = vmul.f32 %v763_v15, %v763_v15  ;;  %v304_v41 = vsel %vm282_vm0, %v299_v34, 0.0  ;;  %s612_s5 = sshll.u32 %s880_s4, 3  ;;  %s460_s21 = scalar_lea.vmem (%p733_p5), %s874_s3, %s621_s14 }
  0x26   : > { %v318_v36 = vsel %vm282_vm0, %v288_v29, 0.0  ;;  %v308_v40 = vadd.f32 %v307_v38, %v306_v37  ;;  %v302_v42 = vmul.f32 %v765_v16, %v765_v16  ;;  %v297_v43 = vmul.f32 %v749_v8, %v749_v8  ;;  %s265_s8 = scalar_lea.vmem %s872_s1, %s612_s5  ;;  %s271_s11 = scalar_lea.vmem %s873_s2, %s612_s5 }
  0x27   : > { %v305_v44 = vadd.f32 %v304_v41, %v303_v35  ;;  %v312_v45 = vsel %vm282_vm0, %v298_v39, 0.0  ;;  %v301_v46 = vmul.f32 %v751_v9, %v751_v9  ;;  %v367_v34 = vld [vmem:[%s265_s8] sm:$0xff]  ;;  %v369_v39 = vld [vmem:[%s265_s8 + $0x10] sm:$0xff] }
  0x28   : > { %v313_v47 = vsel %vm282_vm0, %v302_v42, 0.0  ;;  %v309_v48 = vsel %vm282_vm0, %v297_v43, 0.0  ;;  %v334_v49 = vsel %vm282_vm0, %v308_v40, 0.0  ;;  %v370_v43 = vld [vmem:[%s265_s8 + $0x18] sm:$0xff] }
  0x29   : > { %325 = vadd.xlane.f32.xlu1 %v324_v33  ;;  %319 = vadd.xlane.f32.xlu0 %v318_v36  ;;  %v314_v50 = vadd.f32 %v313_v47, %v312_v45  ;;  %v310_v51 = vsel %vm282_vm0, %v301_v46, 0.0  ;;  %v331_v52 = vsel %vm282_vm0, %v305_v44, 0.0  ;;  %v368_v33 = vld [vmem:[%s265_s8 + $0x8] sm:$0xff]  ;;  %v375_v46 = vld [vmem:[%s271_s11] sm:$0xff] }
  0x2a   : > { %v311_v53 = vadd.f32 %v310_v51, %v309_v48 }
  0x2b   : > { %v340_v54 = vsel %vm282_vm0, %v314_v50, 0.0 }
  0x2c   : > { %v337_v55 = vsel %vm282_vm0, %v311_v53, 0.0 }
  0x2d   : > { %335 = vadd.xlane.f32.xlu1 %v334_v49  ;;  %332 = vadd.xlane.f32.xlu0 %v331_v52  ;;  %v376_v49 = vld [vmem:[%s271_s11 + $0x8] sm:$0xff]  ;;  %v377_v52 = vld [vmem:[%s271_s11 + $0x10] sm:$0xff] }
  0x31   : > { %341 = vadd.xlane.f32.xlu1 %v340_v54  ;;  %338 = vadd.xlane.f32.xlu0 %v337_v55  ;;  %v378_v55 = vld [vmem:[%s271_s11 + $0x18] sm:$0xff] }
  0xb2   : > { %v323_v57 = vpop.xlane.xlu1 %322  ;;  %v317_v58 = vpop.xlane.xlu0 %316 }
  0xb3   : > { %v327_v61 = vmul.f32 0.03125, %v317_v58  ;;  %v329_v4 = vmul.f32 0.03125, %v323_v57 }
  0xb5   : > { %v347_v5 = vmul.f32 %v327_v61, %v327_v61  ;;  %v349_v20 = vmul.f32 %v329_v4, %v329_v4 }
  0xb6   : > { %v326_v59 = vpop.xlane.xlu1 %325  ;;  %v320_v60 = vpop.xlane.xlu0 %319 }
  0xb7   : > { %v328_v62 = vmul.f32 0.03125, %v320_v60  ;;  %v330_v0 = vmul.f32 0.03125, %v326_v59 }
  0xb9   : > { %v348_v1 = vmul.f32 %v328_v62, %v328_v62  ;;  %v350_v14 = vmul.f32 %v330_v0, %v330_v0 }
  0xba   : > { %v336_v63 = vpop.xlane.xlu1 %335  ;;  %v333_v3 = vpop.xlane.xlu0 %332 }
  0xbb   : > { %v344_v2 = vmul.f32 0.03125, %v336_v63  ;;  %v343_v6 = vmul.f32 0.03125, %v333_v3 }
  0xbd   : > { %v352_v7 = vsub.f32 %v344_v2, %v348_v1  ;;  %v351_v11 = vsub.f32 %v343_v6, %v347_v5 }
  0xbe   : > { %v342_v12 = vpop.xlane.xlu1 %341  ;;  %v339_v19 = vpop.xlane.xlu0 %338 }
  0xbf   : > { %v356_v17 = vmax.f32 %v352_v7, 0.0  ;;  %v346_v18 = vmul.f32 0.03125, %v342_v12  ;;  %v355_v21 = vmax.f32 %v351_v11, 0.0  ;;  %v345_v24 = vmul.f32 0.03125, %v339_v19 }
  0xc1   : > { %v360_v25 = vadd.f32 1e-05, %v356_v17  ;;  %v354_v26 = vsub.f32 %v346_v18, %v350_v14  ;;  %v359_v27 = vadd.f32 1e-05, %v355_v21  ;;  %v353_v28 = vsub.f32 %v345_v24, %v349_v20 }
  0xc3   : > { %649 = vrsqrt.f32 %v360_v25  ;;  %v358_v29 = vmax.f32 %v354_v26, 0.0  ;;  %v357_v30 = vmax.f32 %v353_v28, 0.0 }
  0xc4   : > { %651 = vrsqrt.f32 %v359_v27 }
  0xc5   : > { %v362_v31 = vadd.f32 1e-05, %v358_v29  ;;  %v361_v32 = vadd.f32 1e-05, %v357_v30 }
  0xc7   : > { %653 = vrsqrt.f32 %v361_v32 }
  0xc8   : > { %655 = vrsqrt.f32 %v362_v31 }
  0xcd   : > { %v650_v35 = vpop.eup %649 }
  0xce   : > { %v652_v36 = vpop.eup %651  ;;  %v372_v37 = vmul.f32 %v650_v35, %v368_v33 }
  0xcf   : > { %v371_v38 = vmul.f32 %v652_v36, %v367_v34 }
  0xd0   : > { %394 = vperm.xlu1 %648, %v372_v37   ;;  %v380_v48 = vmul.f32 %v372_v37, %v328_v62 }
  0xd1   : > { %389 = vperm.xlu0 %647, %v371_v38   ;;  %v654_v40 = vpop.eup %653  ;;  %v379_v45 = vmul.f32 %v371_v38, %v327_v61 }
  0xd2   : > { %v373_v41 = vmul.f32 %v654_v40, %v369_v39  ;;  %v656_v42 = vpop.eup %655  ;;  %v384_v50 = vsub.f32 %v376_v49, %v380_v48 }
  0xd3   : > { %v374_v44 = vmul.f32 %v656_v42, %v370_v43  ;;  %v383_v47 = vsub.f32 %v375_v46, %v379_v45 }
  0xd4   : > { %399 = vperm.xlu1 %648, %v373_v41   ;;  %v381_v51 = vmul.f32 %v373_v41, %v329_v4 }
  0xd5   : > { %v382_v54 = vmul.f32 %v374_v44, %v330_v0 }
  0xd6   : > { %v385_v53 = vsub.f32 %v377_v52, %v381_v51 }
  0xd7   : > { %v386_v56 = vsub.f32 %v378_v55, %v382_v54 }
  0xd8   : > { %404 = vperm.xlu1 %648, %v374_v44  }
  0xdc   : > { %417 = vperm.xlu1 %648, %v383_v47  }
  0xe0   : > { %422 = vperm.xlu1 %648, %v384_v50  }
  0xe4   : > { %427 = vperm.xlu1 %648, %v385_v53  }
  0xe8   : > { %432 = vperm.xlu1 %648, %v386_v56  }
 0x14f   : > { %v395_v57 = vpop.permute.xlu1 %394 }
 0x150   : > { %v390_v59 = vpop.permute.xlu0 %389  ;;  %v408_v3 = vmul.f32 %v395_v57, %v775_v22  ;;  %v412_v0 = vmul.f32 %v395_v57, %v777_v23 }
 0x151   : > { %v407_v61 = vmul.f32 %v390_v59, %v753_v10  ;;  %v411_v62 = vmul.f32 %v390_v59, %v759_v13 }
 0x153   : > { %v400_v58 = vpop.permute.xlu1 %399 }
 0x154   : > { %v409_v22 = vmul.f32 %v400_v58, %v749_v8  ;;  %v413_v23 = vmul.f32 %v400_v58, %v751_v9 }
 0x157   : > { %v405_v60 = vpop.permute.xlu1 %404 }
 0x158   : > { %v410_v11 = vmul.f32 %v405_v60, %v763_v15  ;;  %v414_v12 = vmul.f32 %v405_v60, %v765_v16 }
 0x15b   : > { %v418_v63 = vpop.permute.xlu1 %417 }
 0x15c   : > { %v435_v1 = vadd.f32 %v418_v63, %v407_v61  ;;  %v439_v2 = vadd.f32 %v418_v63, %v411_v62 }
 0x15e   : > { %443 = vst.msk [vmem:[%s825_s12] sm:$0xff] %vm282_vm0, %v435_v1  ;;  %447 = vst.msk [vmem:[%s825_s12 + $0x20] sm:$0xff] %vm282_vm0, %v439_v2 }
 0x15f   : > { %v423_v10 = vpop.permute.xlu1 %422 }
 0x160   : > { %v436_v13 = vadd.f32 %v423_v10, %v408_v3  ;;  %v440_v4 = vadd.f32 %v423_v10, %v412_v0 }
 0x162   : > { %444 = vst.msk [vmem:[%s825_s12 + $0x8] sm:$0xff] %vm282_vm0, %v436_v13  ;;  %448 = vst.msk [vmem:[%s825_s12 + $0x28] sm:$0xff] %vm282_vm0, %v440_v4 }
 0x163   : > { %v428_v5 = vpop.permute.xlu1 %427 }
 0x164   : > { %v437_v6 = vadd.f32 %v428_v5, %v409_v22  ;;  %v441_v7 = vadd.f32 %v428_v5, %v413_v23  ;;  %457 = sbr.rel (!%p733_p5) target bundleno = 372 (0x174), region = 74 }
 0x165   : > { %v502_v9 = vld [vmem:[%s825_s12] sm:$0xff] (%p733_p5) }
 0x166   : > { %445 = vst.msk [vmem:[%s825_s12 + $0x10] sm:$0xff] %vm282_vm0, %v437_v6  ;;  %449 = vst.msk [vmem:[%s825_s12 + $0x30] sm:$0xff] %vm282_vm0, %v441_v7  ;;  %v510_v19 = vld [vmem:[%s825_s12 + $0x20] sm:$0xff] (%p733_p5) }
 0x167   : > { %v433_v14 = vpop.permute.xlu1 %432  ;;  %503 = vst [vmem:[%s460_s21] sm:$0xff] (%p733_p5), %v502_v9  ;;  %511 = vst [vmem:[%s460_s21 + $0x40] sm:$0xff] (%p733_p5), %v510_v19 }
 0x168   : > { %v438_v17 = vadd.f32 %v433_v14, %v410_v11  ;;  %v442_v8 = vadd.f32 %v433_v14, %v414_v12 }
 0x169   : > { %v504_v15 = vld [vmem:[%s825_s12 + $0x8] sm:$0xff] (%p733_p5) }
 0x16a   : > { %446 = vst.msk [vmem:[%s825_s12 + $0x18] sm:$0xff] %vm282_vm0, %v438_v17  ;;  %450 = vst.msk [vmem:[%s825_s12 + $0x38] sm:$0xff] %vm282_vm0, %v442_v8  ;;  %v512_v20 = vld [vmem:[%s825_s12 + $0x28] sm:$0xff] (%p733_p5) }
 0x16b   : > { %505 = vst [vmem:[%s460_s21 + $0x8] sm:$0xff] %v504_v15  ;;  %513 = vst [vmem:[%s460_s21 + $0x48] sm:$0xff] %v512_v20 }
 0x16d   : > { %v506_v16 = vld [vmem:[%s825_s12 + $0x10] sm:$0xff] }
 0x16e   : > { %507 = vst [vmem:[%s460_s21 + $0x10] sm:$0xff] %v506_v16  ;;  %v514_v21 = vld [vmem:[%s825_s12 + $0x30] sm:$0xff] }
 0x16f   : > { %515 = vst [vmem:[%s460_s21 + $0x50] sm:$0xff] %v514_v21 }
 0x171   : > { %v508_v18 = vld [vmem:[%s825_s12 + $0x18] sm:$0xff] }
 0x172   : > { %509 = vst [vmem:[%s460_s21 + $0x18] sm:$0xff] %v508_v18  ;;  %v516_v24 = vld [vmem:[%s825_s12 + $0x38] sm:$0xff] }
 0x173   : > { %517 = vst [vmem:[%s460_s21 + $0x58] sm:$0xff] %v516_v24 }
 0x174 PF: > { %p10_p11 = scmp.ge.s32.totalorder %s721_s16, 4   ;;  %s876_s12 = smov %s675_s13 }
 0x175   : > { %s877_s13 = smov %s731_s19  ;;  %s878_s14 = smov %s721_s16 }
 0x176   :  { %12 = sbr.rel (!%p10_p11) target bundleno = 2 (0x2), region = 149 }

</bundles_post_ra>
